<compile_context>
chip_gen: v5e
topology: v5e:2x2
jax: 0.10.0
libtpu: 0.0.40
codegen_flags: <defaults>
</compile_context>

<pallas_src>
import functools

import jax
import jax.numpy as jnp
from jax.experimental import pallas as pl
from jax.experimental.pallas import tpu as pltpu


def _round_up(x, m):
    return ((x + m - 1) // m) * m


def _choose_batch_block(n, c, hw_padded, itemsize, target_bytes):
    """How many batch elements to pack per grid step.

    Constraints / preferences:
      * nb must divide N (clean grid).
      * nb*C must be a multiple of 8 OR nb == N (Pallas (8,128) block rule on
        the sublane axis; nb == N means the block equals the full array dim).
      * prefer blocks <= target_bytes (~1-4 MiB hits the HBM roofline).
      * prefer >= 2 grid steps so v7x can shard them across its 2 TensorCores.
      * among those, take the largest nb (amortize the ~0.35us per-step cost).
    """
    per_batch = c * hw_padded * itemsize
    candidates = [nb for nb in range(1, n + 1)
                  if n % nb == 0 and ((nb * c) % 8 == 0 or nb == n)]
    fit_multi = [nb for nb in candidates
                 if nb * per_batch <= target_bytes and n // nb >= 2]
    if fit_multi:
        return max(fit_multi)
    fit = [nb for nb in candidates if nb * per_batch <= target_bytes]
    if fit:
        return max(fit)
    return min(candidates)


def _fusion_kernel(pose_ref, sil_ref, w1p_ref, w1s_ref, b1_ref,
                   w2p_ref, w2s_ref, b2p_ref, b2s_ref, out_ref,
                   *, nb, c, inv_hw):
    # pose_ref / sil_ref / out_ref: (nb*c, HW_pad) — batch*channel on the
    # sublane axis (filled), spatial on the 128-lane axis (lane dense).
    pose = pose_ref[...].astype(jnp.float32)
    sil = sil_ref[...].astype(jnp.float32)

    # AdaptiveAvgPool2d(1): spatial mean per (batch, channel) row. Zero padding
    # on the lane axis does not change the sum; divide by the *true* HW.
    pose_mean = (jnp.sum(pose, axis=1, keepdims=True) * inv_hw).reshape(nb, c)
    sil_mean = (jnp.sum(sil, axis=1, keepdims=True) * inv_hw).reshape(nb, c)

    def mix(x, w):  # x: (nb, c_in), w: (c_out, c_in) -> (nb, c_out)
        if c > 128:
            # Large channel count: the MXU is worth its latency here.
            return jax.lax.dot_general(x, w, (((1,), (1,)), ((), ())),
                                       preferred_element_type=jnp.float32)
        # VPU broadcast-multiply + lane reduction: keeps the tiny MLP off the
        # MXU so its push->pop latency never sits on the step critical path.
        return jnp.sum(x[:, None, :] * w[None, :, :], axis=-1)

    # 1x1 Conv2d(2C -> C) + ReLU; w1 pre-split into pose/sil column halves so
    # no sublane concatenation of the pooled vector is needed.
    hidden = mix(pose_mean, w1p_ref[...]) + mix(sil_mean, w1s_ref[...]) + b1_ref[...]
    hidden = jnp.maximum(hidden, 0.0)                                   # (nb, c)

    # 1x1 Conv2d(C -> 2C) + Sigmoid; w2/b2 pre-split into row halves so no
    # channel chunking of the attention logits is needed.
    att_pose = jax.nn.sigmoid(mix(hidden, w2p_ref[...]) + b2p_ref[...])  # (nb, c)
    att_sil = jax.nn.sigmoid(mix(hidden, w2s_ref[...]) + b2s_ref[...])   # (nb, c)

    # Broadcast the per-(batch, channel) gates across the spatial lanes.
    att_pose_col = att_pose.reshape(nb * c, 1)
    att_sil_col = att_sil.reshape(nb * c, 1)
    fused = att_pose_col * pose + att_sil_col * sil
    out_ref[...] = fused.astype(out_ref.dtype)


def attention_fusion(pose, sil, w1, b1, w2, b2, *,
                     target_block_bytes=2 * 1024 * 1024):
    """pose, sil: (N, C, H, W). Returns fused (N, C, H, W) like AttentionFusion."""
    N, C, H, W = pose.shape
    assert sil.shape == pose.shape
    HW = H * W
    HWp = max(_round_up(HW, 128), 128)           # lane-dense, unmasked stores
    itemsize = jnp.dtype(pose.dtype).itemsize

    nb = _choose_batch_block(N, C, HWp, itemsize, target_block_bytes)
    nbc = nb * C
    grid = (N // nb,)

    pose_f = pose.reshape(N, C, HW)
    sil_f = sil.reshape(N, C, HW)
    if HWp != HW:
        pad = ((0, 0), (0, 0), (0, HWp - HW))
        pose_f = jnp.pad(pose_f, pad)
        sil_f = jnp.pad(sil_f, pad)
    pose2d = pose_f.reshape(N * C, HWp)
    sil2d = sil_f.reshape(N * C, HWp)

    # Pre-split the 1x1-conv parameters (done once in the wrapper, not per step).
    w1 = w1.reshape(C, 2 * C)
    w2 = w2.reshape(2 * C, C)
    w1p = jnp.asarray(w1[:, :C], jnp.float32)    # hidden <- pose channels
    w1s = jnp.asarray(w1[:, C:], jnp.float32)    # hidden <- sil channels
    w2p = jnp.asarray(w2[:C, :], jnp.float32)    # att_pose <- hidden
    w2s = jnp.asarray(w2[C:, :], jnp.float32)    # att_sil  <- hidden
    b1r = jnp.asarray(b1.reshape(1, C), jnp.float32)
    b2p = jnp.asarray(b2[:C].reshape(1, C), jnp.float32)
    b2s = jnp.asarray(b2[C:].reshape(1, C), jnp.float32)

    # VMEM budget: 3 streamed arrays (pose, sil, out) x double buffering,
    # plus the (double-buffered) small weights and some slack.
    block_bytes = nbc * HWp * itemsize
    weight_bytes = 4 * (4 * C * C + 3 * C)
    vmem_limit = 3 * 2 * block_bytes + 2 * weight_bytes + (2 << 20)
    vmem_limit = int(min(max(vmem_limit, 8 << 20), 64 << 20))

    kernel = functools.partial(_fusion_kernel, nb=nb, c=C, inv_hw=1.0 / HW)

    big_spec = pl.BlockSpec((nbc, HWp), lambda i: (i, 0))

    def full(shape):
        return pl.BlockSpec(shape, lambda i: (0, 0))

    out2d = pl.pallas_call(
        kernel,
        out_shape=jax.ShapeDtypeStruct((N * C, HWp), pose.dtype),
        grid_spec=pltpu.PrefetchScalarGridSpec(
            num_scalar_prefetch=0,
            grid=grid,
            in_specs=[
                big_spec,                    # pose (nbc, HWp) tiles
                big_spec,                    # sil
                full((C, C)), full((C, C)), full((1, C)),   # w1p, w1s, b1
                full((C, C)), full((C, C)),                 # w2p, w2s
                full((1, C)), full((1, C)),                 # b2p, b2s
            ],
            out_specs=big_spec,
        ),
        compiler_params=pltpu.CompilerParams(
            dimension_semantics=("parallel",),
            vmem_limit_bytes=vmem_limit,
        ),
    )(pose2d, sil2d, w1p, w1s, b1r, w2p, w2s, b2p, b2s)

    out = out2d[:, :HW] if HWp != HW else out2d
    return out.reshape(N, C, H, W)


def attention_fusion_ref(pose, sil, w1, b1, w2, b2):
    """Pure-JAX reference mirroring the PyTorch forward."""
    concat = jnp.concatenate([pose, sil], axis=1)                 # (N, 2C, H, W)
    pooled = jnp.mean(concat, axis=(2, 3))                        # (N, 2C)
    hidden = jnp.maximum(pooled @ w1.T + b1, 0.0)                 # (N, C)
    att = jax.nn.sigmoid(hidden @ w2.T + b2)                      # (N, 2C)
    C = pose.shape[1]
    att_pose = att[:, :C, None, None]
    att_sil = att[:, C:, None, None]
    return att_pose * pose + att_sil * sil


if __name__ == "__main__":
    N, C, H, W = 2, 4, 16, 16

    key = jax.random.PRNGKey(0)
    k_pose, k_sil, k_w1, k_b1, k_w2, k_b2 = jax.random.split(key, 6)

    pose = jax.random.normal(k_pose, (N, C, H, W), dtype=jnp.float32)
    sil = jax.random.normal(k_sil, (N, C, H, W), dtype=jnp.float32)

    # Conv2d 1x1 weights squeezed to 2-D: (C_out, C_in).
    w1 = 0.1 * jax.random.normal(k_w1, (C, 2 * C), dtype=jnp.float32)   # 2C -> C
    b1 = 0.1 * jax.random.normal(k_b1, (C,), dtype=jnp.float32)
    w2 = 0.1 * jax.random.normal(k_w2, (2 * C, C), dtype=jnp.float32)   # C -> 2C
    b2 = 0.1 * jax.random.normal(k_b2, (2 * C,), dtype=jnp.float32)

    fused = attention_fusion(pose, sil, w1, b1, w2, b2)
    fused = jax.block_until_ready(fused)

    ref = attention_fusion_ref(pose, sil, w1, b1, w2, b2)
    assert fused.shape == (N, C, H, W)
    assert jnp.allclose(fused, ref, atol=1e-5, rtol=1e-5), "mismatch vs reference"

    print("KERNEL_OK")
</pallas_src>

<mosaic_0001>
module attributes {stable_mosaic.version = 11 : i64} {
  func.func @_fusion_kernel(%arg0: i32, %arg1: memref<8x256xf32, #tpu.memory_space<vmem>>, %arg2: memref<8x256xf32, #tpu.memory_space<vmem>>, %arg3: memref<4x4xf32, #tpu.memory_space<vmem>>, %arg4: memref<4x4xf32, #tpu.memory_space<vmem>>, %arg5: memref<1x4xf32, #tpu.memory_space<vmem>>, %arg6: memref<4x4xf32, #tpu.memory_space<vmem>>, %arg7: memref<4x4xf32, #tpu.memory_space<vmem>>, %arg8: memref<1x4xf32, #tpu.memory_space<vmem>>, %arg9: memref<1x4xf32, #tpu.memory_space<vmem>>, %arg10: memref<8x256xf32, #tpu.memory_space<vmem>>) attributes {dimension_semantics = [#tpu.dimension_semantics<parallel>], iteration_bounds = array<i64: 1>, scalar_prefetch = 0 : i64, scratch_operands = 0 : i64, tpu.core_type = #tpu.core_type<tc>, window_params = [{transform_indices = @transform_0, window_bounds = array<i64: 8, 256>}, {transform_indices = @transform_1, window_bounds = array<i64: 8, 256>}, {pipeline_mode = #tpu.pipeline_mode<synchronous>, transform_indices = @transform_2, window_bounds = array<i64: 4, 4>}, {pipeline_mode = #tpu.pipeline_mode<synchronous>, transform_indices = @transform_3, window_bounds = array<i64: 4, 4>}, {pipeline_mode = #tpu.pipeline_mode<synchronous>, transform_indices = @transform_4, window_bounds = array<i64: 1, 4>}, {pipeline_mode = #tpu.pipeline_mode<synchronous>, transform_indices = @transform_5, window_bounds = array<i64: 4, 4>}, {pipeline_mode = #tpu.pipeline_mode<synchronous>, transform_indices = @transform_6, window_bounds = array<i64: 4, 4>}, {pipeline_mode = #tpu.pipeline_mode<synchronous>, transform_indices = @transform_7, window_bounds = array<i64: 1, 4>}, {pipeline_mode = #tpu.pipeline_mode<synchronous>, transform_indices = @transform_8, window_bounds = array<i64: 1, 4>}, {transform_indices = @transform_9, window_bounds = array<i64: 8, 256>}]} {
    %c0 = arith.constant 0 : index
    %c0_0 = arith.constant 0 : index
    %0 = vector.load %arg1[%c0, %c0_0] : memref<8x256xf32, #tpu.memory_space<vmem>>, vector<8x256xf32>
    %c0_1 = arith.constant 0 : index
    %c0_2 = arith.constant 0 : index
    %1 = vector.load %arg2[%c0_1, %c0_2] : memref<8x256xf32, #tpu.memory_space<vmem>>, vector<8x256xf32>
    %cst = arith.constant dense<0.000000e+00> : vector<8xf32>
    %2 = vector.multi_reduction <add>, %0, %cst [1] : vector<8x256xf32> to vector<8xf32>
    %3 = vector.shape_cast %2 : vector<8xf32> to vector<8x1xf32>
    %cst_3 = arith.constant 3.906250e-03 : f32
    %4 = vector.broadcast %cst_3 : f32 to vector<8x1xf32>
    %5 = arith.mulf %3, %4 : vector<8x1xf32>
    %6 = vector.shape_cast %5 : vector<8x1xf32> to vector<2x4xf32>
    %cst_4 = arith.constant dense<0.000000e+00> : vector<8xf32>
    %7 = vector.multi_reduction <add>, %1, %cst_4 [1] : vector<8x256xf32> to vector<8xf32>
    %8 = vector.shape_cast %7 : vector<8xf32> to vector<8x1xf32>
    %cst_5 = arith.constant 3.906250e-03 : f32
    %9 = vector.broadcast %cst_5 : f32 to vector<8x1xf32>
    %10 = arith.mulf %8, %9 : vector<8x1xf32>
    %11 = vector.shape_cast %10 : vector<8x1xf32> to vector<2x4xf32>
    %c0_6 = arith.constant 0 : index
    %c0_7 = arith.constant 0 : index
    %12 = vector.load %arg3[%c0_6, %c0_7] : memref<4x4xf32, #tpu.memory_space<vmem>>, vector<4x4xf32>
    %13 = vector.shape_cast %6 : vector<2x4xf32> to vector<2x1x4xf32>
    %14 = vector.shape_cast %12 : vector<4x4xf32> to vector<1x4x4xf32>
    %15 = vector.broadcast %13 : vector<2x1x4xf32> to vector<2x4x4xf32>
    %16 = vector.broadcast %14 : vector<1x4x4xf32> to vector<2x4x4xf32>
    %17 = arith.mulf %15, %16 : vector<2x4x4xf32>
    %cst_8 = arith.constant dense<0.000000e+00> : vector<2x4xf32>
    %18 = vector.multi_reduction <add>, %17, %cst_8 [2] : vector<2x4x4xf32> to vector<2x4xf32>
    %c0_9 = arith.constant 0 : index
    %c0_10 = arith.constant 0 : index
    %19 = vector.load %arg4[%c0_9, %c0_10] : memref<4x4xf32, #tpu.memory_space<vmem>>, vector<4x4xf32>
    %20 = vector.shape_cast %11 : vector<2x4xf32> to vector<2x1x4xf32>
    %21 = vector.shape_cast %19 : vector<4x4xf32> to vector<1x4x4xf32>
    %22 = vector.broadcast %20 : vector<2x1x4xf32> to vector<2x4x4xf32>
    %23 = vector.broadcast %21 : vector<1x4x4xf32> to vector<2x4x4xf32>
    %24 = arith.mulf %22, %23 : vector<2x4x4xf32>
    %cst_11 = arith.constant dense<0.000000e+00> : vector<2x4xf32>
    %25 = vector.multi_reduction <add>, %24, %cst_11 [2] : vector<2x4x4xf32> to vector<2x4xf32>
    %26 = arith.addf %18, %25 : vector<2x4xf32>
    %c0_12 = arith.constant 0 : index
    %c0_13 = arith.constant 0 : index
    %27 = vector.load %arg5[%c0_12, %c0_13] : memref<1x4xf32, #tpu.memory_space<vmem>>, vector<1x4xf32>
    %28 = vector.broadcast %27 : vector<1x4xf32> to vector<2x4xf32>
    %29 = arith.addf %26, %28 : vector<2x4xf32>
    %cst_14 = arith.constant 0.000000e+00 : f32
    %30 = vector.broadcast %cst_14 : f32 to vector<2x4xf32>
    %31 = arith.maximumf %29, %30 : vector<2x4xf32>
    %c0_15 = arith.constant 0 : index
    %c0_16 = arith.constant 0 : index
    %32 = vector.load %arg6[%c0_15, %c0_16] : memref<4x4xf32, #tpu.memory_space<vmem>>, vector<4x4xf32>
    %33 = vector.shape_cast %31 : vector<2x4xf32> to vector<2x1x4xf32>
    %34 = vector.shape_cast %32 : vector<4x4xf32> to vector<1x4x4xf32>
    %35 = vector.broadcast %33 : vector<2x1x4xf32> to vector<2x4x4xf32>
    %36 = vector.broadcast %34 : vector<1x4x4xf32> to vector<2x4x4xf32>
    %37 = arith.mulf %35, %36 : vector<2x4x4xf32>
    %cst_17 = arith.constant dense<0.000000e+00> : vector<2x4xf32>
    %38 = vector.multi_reduction <add>, %37, %cst_17 [2] : vector<2x4x4xf32> to vector<2x4xf32>
    %c0_18 = arith.constant 0 : index
    %c0_19 = arith.constant 0 : index
    %39 = vector.load %arg8[%c0_18, %c0_19] : memref<1x4xf32, #tpu.memory_space<vmem>>, vector<1x4xf32>
    %40 = vector.broadcast %39 : vector<1x4xf32> to vector<2x4xf32>
    %41 = arith.addf %38, %40 : vector<2x4xf32>
    %42 = arith.negf %41 : vector<2x4xf32>
    %43 = math.exp %42 : vector<2x4xf32>
    %cst_20 = arith.constant 1.000000e+00 : f32
    %44 = vector.broadcast %cst_20 : f32 to vector<2x4xf32>
    %45 = arith.addf %44, %43 : vector<2x4xf32>
    %46 = arith.divf %44, %45 : vector<2x4xf32>
    %c0_21 = arith.constant 0 : index
    %c0_22 = arith.constant 0 : index
    %47 = vector.load %arg7[%c0_21, %c0_22] : memref<4x4xf32, #tpu.memory_space<vmem>>, vector<4x4xf32>
    %48 = vector.shape_cast %31 : vector<2x4xf32> to vector<2x1x4xf32>
    %49 = vector.shape_cast %47 : vector<4x4xf32> to vector<1x4x4xf32>
    %50 = vector.broadcast %48 : vector<2x1x4xf32> to vector<2x4x4xf32>
    %51 = vector.broadcast %49 : vector<1x4x4xf32> to vector<2x4x4xf32>
    %52 = arith.mulf %50, %51 : vector<2x4x4xf32>
    %cst_23 = arith.constant dense<0.000000e+00> : vector<2x4xf32>
    %53 = vector.multi_reduction <add>, %52, %cst_23 [2] : vector<2x4x4xf32> to vector<2x4xf32>
    %c0_24 = arith.constant 0 : index
    %c0_25 = arith.constant 0 : index
    %54 = vector.load %arg9[%c0_24, %c0_25] : memref<1x4xf32, #tpu.memory_space<vmem>>, vector<1x4xf32>
    %55 = vector.broadcast %54 : vector<1x4xf32> to vector<2x4xf32>
    %56 = arith.addf %53, %55 : vector<2x4xf32>
    %57 = arith.negf %56 : vector<2x4xf32>
    %58 = math.exp %57 : vector<2x4xf32>
    %cst_26 = arith.constant 1.000000e+00 : f32
    %59 = vector.broadcast %cst_26 : f32 to vector<2x4xf32>
    %60 = arith.addf %59, %58 : vector<2x4xf32>
    %61 = arith.divf %59, %60 : vector<2x4xf32>
    %62 = vector.shape_cast %46 : vector<2x4xf32> to vector<8x1xf32>
    %63 = vector.shape_cast %61 : vector<2x4xf32> to vector<8x1xf32>
    %64 = vector.broadcast %62 : vector<8x1xf32> to vector<8x256xf32>
    %65 = arith.mulf %64, %0 : vector<8x256xf32>
    %66 = vector.broadcast %63 : vector<8x1xf32> to vector<8x256xf32>
    %67 = arith.mulf %66, %1 : vector<8x256xf32>
    %68 = arith.addf %65, %67 : vector<8x256xf32>
    %c0_27 = arith.constant 0 : index
    %c0_28 = arith.constant 0 : index
    %69 = vector.load %arg10[%c0_27, %c0_28] : memref<8x256xf32, #tpu.memory_space<vmem>>, vector<8x256xf32>
    tpu.vector_store %arg10[%c0_27, %c0_28], %68 {strides = array<i32>} : memref<8x256xf32, #tpu.memory_space<vmem>>, vector<8x256xf32>,
    return
  }
  func.func @transform_0(%arg0: i32) -> (i32, i32) {
    %c0_i32 = arith.constant 0 : i32
    %c0_i32_0 = arith.constant 0 : i32
    return %arg0, %c0_i32 : i32, i32
  }
  func.func @transform_1(%arg0: i32) -> (i32, i32) {
    %c0_i32 = arith.constant 0 : i32
    %c0_i32_0 = arith.constant 0 : i32
    return %arg0, %c0_i32 : i32, i32
  }
  func.func @transform_2(%arg0: i32) -> (i32, i32) {
    %c0_i32 = arith.constant 0 : i32
    %c0_i32_0 = arith.constant 0 : i32
    %c0_i32_1 = arith.constant 0 : i32
    return %c0_i32, %c0_i32_0 : i32, i32
  }
  func.func @transform_3(%arg0: i32) -> (i32, i32) {
    %c0_i32 = arith.constant 0 : i32
    %c0_i32_0 = arith.constant 0 : i32
    %c0_i32_1 = arith.constant 0 : i32
    return %c0_i32, %c0_i32_0 : i32, i32
  }
  func.func @transform_4(%arg0: i32) -> (i32, i32) {
    %c0_i32 = arith.constant 0 : i32
    %c0_i32_0 = arith.constant 0 : i32
    %c0_i32_1 = arith.constant 0 : i32
    return %c0_i32, %c0_i32_0 : i32, i32
  }
  func.func @transform_5(%arg0: i32) -> (i32, i32) {
    %c0_i32 = arith.constant 0 : i32
    %c0_i32_0 = arith.constant 0 : i32
    %c0_i32_1 = arith.constant 0 : i32
    return %c0_i32, %c0_i32_0 : i32, i32
  }
  func.func @transform_6(%arg0: i32) -> (i32, i32) {
    %c0_i32 = arith.constant 0 : i32
    %c0_i32_0 = arith.constant 0 : i32
    %c0_i32_1 = arith.constant 0 : i32
    return %c0_i32, %c0_i32_0 : i32, i32
  }
  func.func @transform_7(%arg0: i32) -> (i32, i32) {
    %c0_i32 = arith.constant 0 : i32
    %c0_i32_0 = arith.constant 0 : i32
    %c0_i32_1 = arith.constant 0 : i32
    return %c0_i32, %c0_i32_0 : i32, i32
  }
  func.func @transform_8(%arg0: i32) -> (i32, i32) {
    %c0_i32 = arith.constant 0 : i32
    %c0_i32_0 = arith.constant 0 : i32
    %c0_i32_1 = arith.constant 0 : i32
    return %c0_i32, %c0_i32_0 : i32, i32
  }
  func.func @transform_9(%arg0: i32) -> (i32, i32) {
    %c0_i32 = arith.constant 0 : i32
    %c0_i32_0 = arith.constant 0 : i32
    return %arg0, %c0_i32 : i32, i32
  }
}

</mosaic_0001>

<bundles_post_ra>
// kernel: tpu_custom_call.1
= control target key start
LH: loop header
LB: loop body
LE: loop exit
PB: predicated region body
PF: predicated region fallthrough
CT: control target
= control target key end

     0   :  { %14 = vsyncpa [#allocation3], 0  ;;  %s1321_s0 = inlined_call_operand.hbm [shape: f32[8,256], index: 0, kind: input, shape index: {}]   ;;  %s1322_s1 = inlined_call_operand.hbm [shape: f32[8,256], index: 1, kind: input, shape index: {}]   ;;  %s1323_s2 = inlined_call_operand.hbm [shape: f32[4,4], index: 2, kind: input, shape index: {}]   ;;  %s1324_s3 = inlined_call_operand.hbm [shape: f32[4,4], index: 3, kind: input, shape index: {}]   ;;  %s1325_s4 = inlined_call_operand.hbm [shape: f32[1,4], index: 4, kind: input, shape index: {}]   ;;  %s1326_s5 = inlined_call_operand.vmem [shape: f32[4,4], index: 5, kind: input, shape index: {}]   ;;  %s1327_s6 = inlined_call_operand.hbm [shape: f32[4,4], index: 6, kind: input, shape index: {}]   ;;  %s1328_s7 = inlined_call_operand.vmem [shape: f32[1,4], index: 7, kind: input, shape index: {}]   ;;  %s1329_s8 = inlined_call_operand.vmem [shape: f32[1,4], index: 8, kind: input, shape index: {}]   ;;  %s1330_s9 = inlined_call_operand.hbm [shape: f32[8,256], index: 9, kind: output, shape index: {}]  }
   0x1   :  { %15 = vsyncpa [#allocation6], 0 }
   0x2   :  { %16 = vsyncpa [#allocation9], 0 }
   0x3   :  { %17 = vsyncpa [#allocation12], 0  ;;  %s35_s11 = sshll.u32 %s1322_s1, 4  ;;  %s36_s11 = int_to_ptr.hbm [resolvable:$true] %s35_s11 }
   0x4   :  { %18 = vsyncpa [#allocation4], 0  ;;  %s1088_s12 = smov [#allocation5]   ;;  %s57_s16 = sshll.u32 %s1324_s3, 4  ;;  %s58_s16 = int_to_ptr.hbm [resolvable:$true] %s57_s16 }
   0x5   :  { %s37_s13 = sshll.u32 %s1088_s12, 4  ;;  %s1089_s17 = smov [#allocation8]   ;;  %s38_s13 = int_to_ptr.vmem [resolvable:$true] %s37_s13 }
   0x6   :  { %40 = dma.hbm_to_vmem [thread:$0]  %s36_s11, 256, %s38_s13, [#allocation6]  }
   0x7   :  { %s59_s18 = sshll.u32 %s1089_s17, 4  ;;  %s24_s21 = sshll.u32 %s1321_s0, 4  ;;  %s60_s18 = int_to_ptr.vmem [resolvable:$true] %s59_s18  ;;  %s25_s21 = int_to_ptr.hbm [resolvable:$true] %s24_s21 }
   0x8   :  { %62 = dma.hbm_to_vmem [thread:$0]  %s58_s16, 64, %s60_s18, [#allocation9]  }
   0x9   :  { %s46_s23 = sshll.u32 %s1323_s2, 4  ;;  %s1090_s24 = smov [#allocation2]   ;;  %s47_s23 = int_to_ptr.hbm [resolvable:$true] %s46_s23 }
   0xa   :  { %s26_s25 = sshll.u32 %s1090_s24, 4  ;;  %s1091_s3 = smov [#allocation7]   ;;  %s27_s25 = int_to_ptr.vmem [resolvable:$true] %s26_s25 }
   0xb   :  { %29 = dma.hbm_to_vmem [thread:$0]  %s25_s21, 256, %s27_s25, [#allocation3]  }
   0xc   :  { %s48_s26 = sshll.u32 %s1091_s3, 4  ;;  %s68_s29 = sshll.u32 %s1325_s4, 4  ;;  %s49_s26 = int_to_ptr.vmem [resolvable:$true] %s48_s26  ;;  %s69_s29 = int_to_ptr.hbm [resolvable:$true] %s68_s29 }
   0xd   :  { %51 = dma.hbm_to_vmem [thread:$0]  %s47_s23, 64, %s49_s26, [#allocation6]  }
   0xe   :  { %s81_s10 = sshll.u32 %s1327_s6, 4  ;;  %s1092_s11 = smov [#allocation10]   ;;  %s82_s10 = int_to_ptr.hbm [resolvable:$true] %s81_s10 }
   0xf   :  { %s70_s2 = sshll.u32 %s1092_s11, 4  ;;  %s1093_s12 = smov [#allocation11]   ;;  %s71_s2 = int_to_ptr.vmem [resolvable:$true] %s70_s2 }
  0x10   :  { %73 = dma.hbm_to_vmem [thread:$0]  %s69_s29, 16, %s71_s2, [#allocation9]  }
  0x11   :  { %s83_s13 = sshll.u32 %s1093_s12, 4  ;;  %s84_s13 = int_to_ptr.vmem [resolvable:$true] %s83_s13 }
  0x12   :  { %86 = dma.hbm_to_vmem [thread:$0]  %s82_s10, 64, %s84_s13, [#allocation12]  }
  0x13   :  { %1078 = dma.done.wait [#allocation3], 256  }
  0x14   :  { %1079 = vsyncadd [#allocation3], 4294967040 }
  0x15   :  { %1080 = dma.done.wait [#allocation6], 320  }
  0x16   :  { %1081 = vsyncadd [#allocation6], 4294966976 }
  0x17   :  { %1082 = dma.done.wait [#allocation9], 80  }
  0x18   :  { %1083 = vsyncadd [#allocation9], 4294967216 }
  0x19   :  { %1084 = dma.done.wait [#allocation12], 64  }
  0x1a   :  { %1085 = vsyncadd [#allocation12], 4294967232  ;;  %v146_v0 = vlaneseq  ;;  %v1172_v2 = vld [vmem:[#allocation2] sm:$0xff]  ;;  %v1174_v3 = vld [vmem:[#allocation2 + $0x8] sm:$0xff]  ;;  %v1094_v19 = vmov 0   ;;  %vm278_vm0 = vcmask 1041409  }
  0x1b   :  { %v127_v4 = vld [vmem:[#allocation7] sm:$0xf]  ;;  %v119_v5 = vadd.f32 %v1174_v3, %v1172_v2  ;;  %v1178_v6 = vld [vmem:[#allocation5] sm:$0xff]  ;;  %v1180_v7 = vld [vmem:[#allocation5 + $0x8] sm:$0xff]  ;;  %v1095_v21 = vmov 839922192  }
  0x1c   :  { %v1167_v1 = vshrl.u32 %v146_v0, 7  ;;  %140 = vst [vmem:[#allocation1] ss:$2 sm:$0xff] %v127_v4  ;;  %v123_v8 = vadd.f32 %v1180_v7, %v1178_v6  ;;  %v130_v22 = vunpack.c.l.s4 %v1095_v21  ;;  %v1096_v26 = vmov 1985246804   ;;  %s844_s19 = sshll.u32 %s1330_s9, 4  ;;  %s845_s19 = int_to_ptr.hbm [resolvable:$true] %s844_s19 }
  0x1d   :  { %143 = vst [vmem:[#allocation1 + $0x10] ss:$2 sm:$0xff] %v127_v4  ;;  %120 = vadd.xlane.f32.xlu0 %v119_v5  ;;  %v134_v27 = vunpack.c.l.s4 %v1096_v26  ;;  %v296_v53 = vld [vmem:[#allocation8] sm:$0xf]  ;;  %vm280_vm1 = vcmask 1042434   ;;  %vm282_vm2 = vcmask 1043459  }
  0x1e   :  { %871 = vset.pattern.permute.xlu1 %v1167_v1  ;;  %872 = vset.pattern.permute.xlu2 %v1167_v1  ;;  %v1186_v23 = vunpack.c.0.s8 %v130_v22  ;;  %vm289_vm3 = vcmask 27648  }
  0x1f   :  { %873 = vset.pattern.permute.xlu0 %v1167_v1  ;;  %v135_v30 = vunpack.c.0.s8 %v134_v27 }
  0x23   :  { %v141_v9 = vld.sshfl [vmem:[#allocation1] sm:$0xff pattern:$0x75316420] }
  0x24   :  { %v145_v10 = vperm.slane %v141_v9, 0  ;;  %v159_v11 = vperm.slane %v141_v9, 2  ;;  %v152_v12 = vperm.slane %v141_v9, 1  ;;  %v166_v13 = vperm.slane %v141_v9, 3  ;;  %v891_v9 = vld [vmem:[#allocation10] ss:$0 sm:$0xff] }
  0x25   :  { %124 = vadd.xlane.f32.xlu0 %v123_v8  ;;  %v144_v14 = vld.sshfl [vmem:[#allocation1 + $0x10] sm:$0xff pattern:$0x75316420] }
  0x26   :  { %150 = vperm.xlu1 %871, %v145_v10   ;;  %164 = vperm.xlu2 %872, %v159_v11   ;;  %v180_v15 = vperm.slane %v144_v14, 1  ;;  %v187_v16 = vperm.slane %v144_v14, 2  ;;  %v173_v17 = vperm.slane %v144_v14, 0  ;;  %v194_v18 = vperm.slane %v144_v14, 3 }
  0x2e   :  { %157 = vperm.xlu1 %871, %v152_v12   ;;  %171 = vperm.xlu2 %872, %v166_v13  }
  0x36   :  { %185 = vperm.xlu1 %871, %v180_v15   ;;  %192 = vperm.xlu2 %872, %v187_v16   ;;  %v1200_v15 = vand.u32 127, %v146_v0 }
  0x39   :  { %178 = vperm.xlu0 %873, %v173_v17  }
  0x3e   :  { %199 = vperm.xlu1 %871, %v194_v18   ;;  %874 = vset.pattern.permute.xlu2 %v1094_v19 }
  0x46   :  { %875 = vset.pattern.permute.xlu1 %v1094_v19 }
  0x80   :  { %v165_v20 = vpop.permute.xlu2 %164 }
  0x88   :  { %v172_v24 = vpop.permute.xlu2 %171 }
  0x90   :  { %v121_v25 = vpop.xlane.xlu0 %120  ;;  %v193_v38 = vpop.permute.xlu2 %192 }
  0x91   :  { %v122_v28 = vmul.f32 0.00390625, %v121_v25 }
  0x93   :  { %v132_v29 = vperm.slane %v122_v28, %v1186_v23  ;;  %v136_v36 = vperm.slane %v122_v28, %v135_v30 }
  0x95   :  { %v211_v31 = vmul.f32 %v165_v20, %v132_v29  ;;  %v212_v32 = vmul.f32 %v172_v24, %v132_v29  ;;  %v215_v40 = vmul.f32 %v193_v38, %v136_v36 }
  0x97   :  { %231 = vst [vmem:[#allocation1 + $0x20] ss:$2 sm:$0xff] %v211_v31 }
  0x98   :  { %v151_v33 = vpop.permute.xlu1 %150  ;;  %234 = vst [vmem:[#allocation1 + $0x30] ss:$2 sm:$0xff] %v212_v32  ;;  %v125_v35 = vpop.xlane.xlu0 %124 }
  0x99   :  { %v209_v34 = vmul.f32 %v151_v33, %v132_v29  ;;  %v1189_v37 = vmul.f32 0.00390625, %v125_v35 }
  0x9b   :  { %225 = vst [vmem:[#allocation1] ss:$2 sm:$0xff] %v209_v34  ;;  %v1192_v39 = vperm.slane %v1189_v37, %v135_v30  ;;  %v301_v0 = vperm.slane %v1189_v37, %v1186_v23 }
  0x9e   :  { %v232_v41 = vld.sshfl [vmem:[#allocation1 + $0x20] sm:$0xff pattern:$0x75316420] }
  0x9f   :  { %240 = vst [vmem:[#allocation1 + $0x20] ss:$2 sm:$0xff] %v215_v40  ;;  %v235_v52 = vld.sshfl [vmem:[#allocation1 + $0x30] sm:$0xff pattern:$0x75316420] }
  0xa0   :  { %v158_v42 = vpop.permute.xlu1 %157 }
  0xa1   :  { %v210_v43 = vmul.f32 %v158_v42, %v132_v29 }
  0xa2   :  { %v226_v44 = vld.sshfl [vmem:[#allocation1] sm:$0xff pattern:$0x75316420] }
  0xa3   :  { %228 = vst [vmem:[#allocation1 + $0x10] ss:$2 sm:$0xff] %v210_v43  ;;  %245 = vperm.xlu2 %874, %v226_v44  }
  0xa6   :  { %v241_v56 = vld.sshfl [vmem:[#allocation1 + $0x20] sm:$0xff pattern:$0x75316420] }
  0xa8   :  { %v186_v45 = vpop.permute.xlu1 %185 }
  0xa9   :  { %v214_v46 = vmul.f32 %v186_v45, %v136_v36 }
  0xaa   :  { %v229_v47 = vld.sshfl [vmem:[#allocation1 + $0x10] sm:$0xff pattern:$0x75316420] }
  0xab   :  { %248 = vperm.xlu1 %875, %v229_v47   ;;  %238 = vst [vmem:[#allocation1 + $0x10] ss:$2 sm:$0xff] %v214_v46  ;;  %251 = vperm.xlu2 %874, %v232_v41   ;;  %v179_v48 = vpop.permute.xlu0 %178 }
  0xac   :  { %v213_v49 = vmul.f32 %v179_v48, %v136_v36 }
  0xae   :  { %236 = vst [vmem:[#allocation1] ss:$2 sm:$0xff] %v213_v49 }
  0xb0   :  { %v200_v50 = vpop.permute.xlu1 %199 }
  0xb1   :  { %v216_v51 = vmul.f32 %v200_v50, %v136_v36 }
  0xb2   :  { %v239_v54 = vld.sshfl [vmem:[#allocation1 + $0x10] sm:$0xff pattern:$0x75316420] }
  0xb3   :  { %242 = vst [vmem:[#allocation1 + $0x30] ss:$2 sm:$0xff] %v216_v51  ;;  %254 = vperm.xlu1 %875, %v235_v52  }
  0xb4   :  { %312 = vst [vmem:[#allocation1 + $0x10] ss:$2 sm:$0xff] %v296_v53 }
  0xb5   :  { %v237_v55 = vld.sshfl [vmem:[#allocation1] sm:$0xff pattern:$0x75316420] }
  0xb6   :  { %257 = vperm.xlu2 %874, %v237_v55   ;;  %309 = vst [vmem:[#allocation1] ss:$2 sm:$0xff] %v296_v53 }
  0xba   :  { %v243_v10 = vld.sshfl [vmem:[#allocation1 + $0x30] sm:$0xff pattern:$0x75316420] }
  0xbb   :  { %260 = vperm.xlu1 %875, %v239_v54   ;;  %v313_v59 = vld.sshfl [vmem:[#allocation1 + $0x10] sm:$0xff pattern:$0x75316420] }
  0xbc   :  { %v342_v61 = vperm.slane %v313_v59, 0  ;;  %v349_v4 = vperm.slane %v313_v59, 1  ;;  %v356_v5 = vperm.slane %v313_v59, 2  ;;  %v363_v8 = vperm.slane %v313_v59, 3 }
  0xbd   :  { %v310_v57 = vld.sshfl [vmem:[#allocation1] sm:$0xff pattern:$0x75316420] }
  0xbe   :  { %263 = vperm.xlu2 %874, %v241_v56   ;;  %v314_v58 = vperm.slane %v310_v57, 0  ;;  %v321_v60 = vperm.slane %v310_v57, 1  ;;  %v335_v62 = vperm.slane %v310_v57, 3  ;;  %v328_v63 = vperm.slane %v310_v57, 2 }
  0xc0   :  { %319 = vperm.xlu0 %873, %v314_v58  }
  0xc3   :  { %877 = vset.pattern.permute.xlu1 %v1167_v1 }
  0xc6   :  { %876 = vset.pattern.permute.xlu2 %v1167_v1 }
  0xc8   :  { %326 = vperm.xlu0 %873, %v321_v60  }
  0xcb   :  { %347 = vperm.xlu1 %877, %v342_v61  }
  0xce   :  { %340 = vperm.xlu2 %876, %v335_v62  }
  0xd0   :  { %333 = vperm.xlu0 %873, %v328_v63   ;;  %v475_v63 = vld [vmem:[%s1326_s5] sm:$0xf] }
  0xd3   :  { %880 = vset.pattern.permute.xlu1 %v1094_v19 }
  0xd6   :  { %879 = vset.pattern.permute.xlu2 %v1094_v19 }
  0xd8   :  { %354 = vperm.xlu0 %873, %v349_v4   ;;  %v477_v4 = vperm.slane %v475_v63, 0 }
  0xe0   :  { %361 = vperm.xlu0 %873, %v356_v5   ;;  %v484_v5 = vperm.slane %v475_v63, 1 }
  0xe8   :  { %368 = vperm.xlu0 %873, %v363_v8   ;;  %v498_v8 = vperm.slane %v475_v63, 3 }
  0xf0   :  { %468 = vperm.xlu0 %873, %v891_v9   ;;  %v491_v9 = vperm.slane %v475_v63, 2 }
  0xf8   :  { %878 = vset.pattern.permute.xlu0 %v1094_v19 }
  0xf9   :  { %266 = vperm.xlu0 %878, %v243_v10   ;;  %v621_v10 = vld [vmem:[#allocation11] sm:$0xf] }
  0xfd   :  { %v246_v11 = vpop.permute.xlu2 %245 }
  0xfe   :  { %v270_v18 = vperm.slane %v246_v11, %v1200_v15  ;;  %v623_v11 = vperm.slane %v621_v10, 0 }
 0x105   :  { %v252_v12 = vpop.permute.xlu2 %251 }
 0x106   :  { %v272_v21 = vperm.slane %v252_v12, %v1200_v15  ;;  %v630_v12 = vperm.slane %v621_v10, 1 }
 0x110   :  { %v258_v13 = vpop.permute.xlu2 %257 }
 0x111   :  { %v274_v31 = vperm.slane %v258_v13, %v1200_v15  ;;  %v637_v13 = vperm.slane %v621_v10, 2 }
 0x118   :  { %v264_v17 = vpop.permute.xlu2 %263 }
 0x119   :  { %v276_v33 = vperm.slane %v264_v17, %v1200_v15 }
 0x11d   :  { %v249_v14 = vpop.permute.xlu1 %248 }
 0x11e   :  { %v271_v16 = vperm.slane %v249_v14, %v1200_v15  ;;  %v644_v14 = vperm.slane %v621_v10, 3 }
 0x120   :  { %v279_v20 = vsel %vm278_vm0, %v271_v16, %v270_v18 }
 0x121   :  { %v281_v25 = vsel %vm280_vm1, %v272_v21, %v279_v20 }
 0x125   :  { %v255_v22 = vpop.permute.xlu1 %254 }
 0x126   :  { %v273_v24 = vperm.slane %v255_v22, %v1200_v15 }
 0x128   :  { %v283_v26 = vsel %vm282_vm2, %v273_v24, %v281_v25  ;;  %v341_v27 = vpop.permute.xlu2 %340 }
 0x129   :  { %v290_v28 = vsel %vm289_vm3, %v283_v26, 0.0  ;;  %v381_v29 = vmul.f32 %v341_v27, %v301_v0 }
 0x12a   :  { %291 = vadd.xlane.f32.xlu1 %v290_v28 }
 0x12b   :  { %403 = vst [vmem:[#allocation1 + $0x30] ss:$2 sm:$0xff] %v381_v29 }
 0x12d   :  { %v261_v30 = vpop.permute.xlu1 %260 }
 0x12e   :  { %v275_v32 = vperm.slane %v261_v30, %v1200_v15 }
 0x130   :  { %v284_v34 = vsel %vm278_vm0, %v275_v32, %v274_v31 }
 0x131   :  { %v285_v35 = vsel %vm280_vm1, %v276_v33, %v284_v34 }
 0x132   :  { %v320_v36 = vpop.permute.xlu0 %319  ;;  %v404_v55 = vld.sshfl [vmem:[#allocation1 + $0x30] sm:$0xff pattern:$0x75316420] }
 0x133   :  { %v378_v37 = vmul.f32 %v320_v36, %v301_v0 }
 0x135   :  { %394 = vst [vmem:[#allocation1] ss:$2 sm:$0xff] %v378_v37 }
 0x13a   :  { %v327_v38 = vpop.permute.xlu0 %326 }
 0x13b   :  { %v379_v40 = vmul.f32 %v327_v38, %v301_v0 }
 0x13c   :  { %v395_v43 = vld.sshfl [vmem:[#allocation1] sm:$0xff pattern:$0x75316420] }
 0x13d   :  { %v348_v41 = vpop.permute.xlu1 %347  ;;  %397 = vst [vmem:[#allocation1 + $0x10] ss:$2 sm:$0xff] %v379_v40 }
 0x13e   :  { %v382_v42 = vmul.f32 %v348_v41, %v1192_v39 }
 0x140   :  { %405 = vst [vmem:[#allocation1] ss:$2 sm:$0xff] %v382_v42 }
 0x142   :  { %v334_v44 = vpop.permute.xlu0 %333 }
 0x143   :  { %v380_v45 = vmul.f32 %v334_v44, %v301_v0 }
 0x144   :  { %v398_v46 = vld.sshfl [vmem:[#allocation1 + $0x10] sm:$0xff pattern:$0x75316420] }
 0x145   :  { %400 = vst [vmem:[#allocation1 + $0x20] ss:$2 sm:$0xff] %v380_v45  ;;  %417 = vperm.xlu1 %880, %v398_v46  }
 0x147   :  { %v406_v49 = vld.sshfl [vmem:[#allocation1] sm:$0xff pattern:$0x75316420] }
 0x14a   :  { %v355_v47 = vpop.permute.xlu0 %354 }
 0x14b   :  { %v383_v48 = vmul.f32 %v355_v47, %v1192_v39 }
 0x14c   :  { %v401_v50 = vld.sshfl [vmem:[#allocation1 + $0x20] sm:$0xff pattern:$0x75316420] }
 0x14d   :  { %407 = vst [vmem:[#allocation1 + $0x10] ss:$2 sm:$0xff] %v383_v48  ;;  %426 = vperm.xlu1 %880, %v406_v49   ;;  %420 = vperm.xlu0 %878, %v401_v50  }
 0x152   :  { %v362_v51 = vpop.permute.xlu0 %361 }
 0x153   :  { %v384_v52 = vmul.f32 %v362_v51, %v1192_v39 }
 0x155   :  { %409 = vst [vmem:[#allocation1 + $0x20] ss:$2 sm:$0xff] %v384_v52 }
 0x15a   :  { %v369_v53 = vpop.permute.xlu0 %368 }
 0x15b   :  { %v385_v54 = vmul.f32 %v369_v53, %v1192_v39  ;;  %v408_v39 = vld.sshfl [vmem:[#allocation1 + $0x10] sm:$0xff pattern:$0x75316420] }
 0x15c   :  { %v410_v56 = vld.sshfl [vmem:[#allocation1 + $0x20] sm:$0xff pattern:$0x75316420] }
 0x15d   :  { %411 = vst [vmem:[#allocation1 + $0x30] ss:$2 sm:$0xff] %v385_v54  ;;  %432 = vperm.xlu1 %880, %v410_v56  }
 0x162   :  { %v1221_v57 = vpop.permute.xlu0 %468 }
 0x164   :  { %v412_v58 = vld.sshfl [vmem:[#allocation1 + $0x30] sm:$0xff pattern:$0x75316420] }
 0x165   :  { %435 = vperm.xlu0 %878, %v412_v58   ;;  %883 = vset.pattern.permute.xlu1 %v1167_v1 }
 0x16b   :  { %v267_v59 = vpop.permute.xlu0 %266 }
 0x16c   :  { %v277_v60 = vperm.slane %v267_v59, %v1200_v15 }
 0x16d   :  { %881 = vset.pattern.permute.xlu0 %v1167_v1  ;;  %628 = vperm.xlu1 %883, %v623_v11  }
 0x16e   :  { %v286_v61 = vsel %vm282_vm2, %v277_v60, %v285_v35 }
 0x16f   :  { %v293_v62 = vsel %vm289_vm3, %v286_v61, 0.0 }
 0x170   :  { %294 = vadd.xlane.f32.xlu2 %v293_v62 }
 0x175   :  { %482 = vperm.xlu0 %881, %v477_v4   ;;  %885 = vset.pattern.permute.xlu1 %v1094_v19 }
 0x17d   :  { %489 = vperm.xlu0 %881, %v484_v5  }
 0x185   :  { %496 = vperm.xlu0 %881, %v491_v9  }
 0x188   :  { %414 = vperm.xlu2 %879, %v395_v43  }
 0x18d   :  { %635 = vperm.xlu0 %881, %v630_v12  }
 0x190   :  { %423 = vperm.xlu2 %879, %v404_v55  }
 0x195   :  { %642 = vperm.xlu0 %881, %v637_v13  }
 0x198   :  { %429 = vperm.xlu2 %879, %v408_v39  }
 0x19d   :  { %649 = vperm.xlu0 %881, %v644_v14   ;;  %v292_v16 = vpop.xlane.xlu1 %291 }
 0x1a0   :  { %882 = vset.pattern.permute.xlu2 %v1167_v1 }
 0x1a5   :  { %886 = vset.pattern.permute.xlu0 %v1094_v19 }
 0x1a8   :  { %503 = vperm.xlu2 %882, %v498_v8  }
 0x1b0   :  { %884 = vset.pattern.permute.xlu2 %v1094_v19 }
 0x1b7   :  { %v418_v18 = vpop.permute.xlu1 %417 }
 0x1b8   :  { %v438_v22 = vperm.slane %v418_v18, %v1200_v15 }
 0x1bf   :  { %v421_v24 = vpop.permute.xlu0 %420  ;;  %v427_v25 = vpop.permute.xlu1 %426 }
 0x1c0   :  { %v439_v26 = vperm.slane %v421_v24, %v1200_v15  ;;  %v441_v35 = vperm.slane %v427_v25, %v1200_v15 }
 0x1cf   :  { %v433_v32 = vpop.permute.xlu1 %432 }
 0x1d0   :  { %v443_v37 = vperm.slane %v433_v32, %v1200_v15 }
 0x1d7   :  { %v436_v33 = vpop.permute.xlu0 %435 }
 0x1d8   :  { %v444_v38 = vperm.slane %v436_v33, %v1200_v15 }
 0x1df   :  { %v629_v50 = vpop.permute.xlu1 %628 }
 0x1e3   :  { %v295_v17 = vpop.xlane.xlu2 %294 }
 0x1e7   :  { %v483_v44 = vpop.permute.xlu0 %482 }
 0x1eb   :  { %v415_v20 = vpop.permute.xlu2 %414 }
 0x1ec   :  { %v437_v21 = vperm.slane %v415_v20, %v1200_v15 }
 0x1ee   :  { %v445_v0 = vsel %vm278_vm0, %v438_v22, %v437_v21 }
 0x1ef   :  { %v446_v29 = vsel %vm280_vm1, %v439_v26, %v445_v0  ;;  %v490_v45 = vpop.permute.xlu0 %489 }
 0x1f3   :  { %v424_v27 = vpop.permute.xlu2 %423 }
 0x1f4   :  { %v440_v28 = vperm.slane %v424_v27, %v1200_v15 }
 0x1f6   :  { %v447_v30 = vsel %vm282_vm2, %v440_v28, %v446_v29 }
 0x1f7   :  { %v453_v31 = vsel %vm289_vm3, %v447_v30, 0.0  ;;  %v497_v47 = vpop.permute.xlu0 %496 }
 0x1f8   :  { %454 = vadd.xlane.f32.xlu2 %v453_v31 }
 0x1fb   :  { %v430_v34 = vpop.permute.xlu2 %429 }
 0x1fc   :  { %v442_v36 = vperm.slane %v430_v34, %v1200_v15 }
 0x1fe   :  { %v448_v40 = vsel %vm278_vm0, %v442_v36, %v441_v35 }
 0x1ff   :  { %v449_v41 = vsel %vm280_vm1, %v443_v37, %v448_v40  ;;  %v636_v52 = vpop.permute.xlu0 %635 }
 0x200   :  { %v450_v42 = vsel %vm282_vm2, %v444_v38, %v449_v41 }
 0x201   :  { %v456_v43 = vsel %vm289_vm3, %v450_v42, 0.0 }
 0x202   :  { %457 = vadd.xlane.f32.xlu1 %v456_v43 }
 0x203   :  { %v504_v46 = vpop.permute.xlu2 %503 }
 0x207   :  { %v643_v60 = vpop.permute.xlu0 %642 }
 0x20f   :  { %v650_v14 = vpop.permute.xlu0 %649 }
 0x26b   :  { %v455_v48 = vpop.xlane.xlu2 %454 }
 0x26c   :  { %v459_v49 = vadd.f32 %v455_v48, %v292_v16 }
 0x26e   :  { %v471_v51 = vadd.f32 %v1221_v57, %v459_v49 }
 0x270   :  { %v473_v53 = vmax.f32 %v471_v51, 0.0 }
 0x272   :  { %v509_v54 = vmul.f32 %v483_v44, %v473_v53  ;;  %v510_v55 = vmul.f32 %v490_v45, %v473_v53  ;;  %v511_v56 = vmul.f32 %v497_v47, %v473_v53  ;;  %v655_v62 = vmul.f32 %v629_v50, %v473_v53 }
 0x273   :  { %v656_v39 = vmul.f32 %v636_v52, %v473_v53  ;;  %v657_v63 = vmul.f32 %v643_v60, %v473_v53  ;;  %v512_v8 = vmul.f32 %v504_v46, %v473_v53 }
 0x274   :  { %526 = vperm.xlu2 %884, %v509_v54   ;;  %529 = vperm.xlu1 %885, %v510_v55  }
 0x275   :  { %532 = vperm.xlu0 %886, %v511_v56   ;;  %v458_v58 = vpop.xlane.xlu1 %457 }
 0x276   :  { %v460_v59 = vadd.f32 %v458_v58, %v295_v17  ;;  %v658_v17 = vmul.f32 %v650_v14, %v473_v53 }
 0x278   :  { %v472_v61 = vadd.f32 %v1221_v57, %v460_v59 }
 0x27a   :  { %v474_v4 = vmax.f32 %v472_v61, 0.0 }
 0x27c   :  { %672 = vperm.xlu2 %884, %v655_v62   ;;  %675 = vperm.xlu1 %885, %v656_v39   ;;  %v513_v5 = vmul.f32 %v483_v44, %v474_v4  ;;  %v659_v9 = vmul.f32 %v629_v50, %v474_v4  ;;  %v660_v10 = vmul.f32 %v636_v52, %v474_v4 }
 0x27d   :  { %678 = vperm.xlu0 %886, %v657_v63   ;;  %v514_v11 = vmul.f32 %v490_v45, %v474_v4  ;;  %v516_v12 = vmul.f32 %v504_v46, %v474_v4  ;;  %v515_v57 = vmul.f32 %v497_v47, %v474_v4  ;;  %v661_v13 = vmul.f32 %v643_v60, %v474_v4 }
 0x27e   :  { %v662_v16 = vmul.f32 %v650_v14, %v474_v4 }
 0x284   :  { %538 = vperm.xlu2 %884, %v513_v5   ;;  %535 = vperm.xlu1 %885, %v512_v8   ;;  %v892_v5 = vld [vmem:[%s1329_s8] ss:$0 sm:$0xff] }
 0x285   :  { %684 = vperm.xlu0 %886, %v659_v9  }
 0x28c   :  { %687 = vperm.xlu2 %884, %v660_v10   ;;  %541 = vperm.xlu1 %885, %v514_v11   ;;  %v893_v10 = vld [vmem:[%s1328_s7] ss:$0 sm:$0xff]  ;;  %s1097_s7 = smov [#allocation13]  }
 0x28d   :  { %547 = vperm.xlu0 %886, %v516_v12   ;;  %s842_s8 = sshll.u32 %s1097_s7, 4  ;;  %s843_s8 = int_to_ptr.vmem [resolvable:$true] %s842_s8 }
 0x294   :  { %544 = vperm.xlu1 %885, %v515_v57   ;;  %690 = vperm.xlu2 %884, %v661_v13  }
 0x29c   :  { %693 = vperm.xlu1 %885, %v662_v16   ;;  %681 = vperm.xlu2 %884, %v658_v17  }
 0x2a4   :  { %888 = vset.pattern.permute.xlu1 %v1167_v1  ;;  %887 = vset.pattern.permute.xlu2 %v1167_v1 }
 0x2ce   :  { %v527_v18 = vpop.permute.xlu2 %526 }
 0x2cf   :  { %v549_v30 = vperm.slane %v527_v18, %v1200_v15 }
 0x2d6   :  { %v673_v20 = vpop.permute.xlu2 %672 }
 0x2d7   :  { %v695_v31 = vperm.slane %v673_v20, %v1200_v15 }
 0x2de   :  { %v539_v21 = vpop.permute.xlu2 %538 }
 0x2df   :  { %v553_v50 = vperm.slane %v539_v21, %v1200_v15 }
 0x2e6   :  { %v530_v22 = vpop.permute.xlu1 %529  ;;  %v688_v24 = vpop.permute.xlu2 %687 }
 0x2e7   :  { %v533_v25 = vpop.permute.xlu0 %532  ;;  %v550_v27 = vperm.slane %v530_v22, %v1200_v15  ;;  %v700_v59 = vperm.slane %v688_v24, %v1200_v15 }
 0x2e8   :  { %v551_v32 = vperm.slane %v533_v25, %v1200_v15 }
 0x2e9   :  { %v557_v33 = vsel %vm278_vm0, %v550_v27, %v549_v30 }
 0x2ea   :  { %v558_v40 = vsel %vm280_vm1, %v551_v32, %v557_v33 }
 0x2ee   :  { %v676_v0 = vpop.permute.xlu1 %675  ;;  %v691_v26 = vpop.permute.xlu2 %690 }
 0x2ef   :  { %v696_v28 = vperm.slane %v676_v0, %v1200_v15  ;;  %v679_v29 = vpop.permute.xlu0 %678  ;;  %v701_v62 = vperm.slane %v691_v26, %v1200_v15 }
 0x2f0   :  { %v697_v1 = vperm.slane %v679_v29, %v1200_v15 }
 0x2f1   :  { %v703_v34 = vsel %vm278_vm0, %v696_v28, %v695_v31 }
 0x2f2   :  { %v704_v41 = vsel %vm280_vm1, %v697_v1, %v703_v34 }
 0x2f6   :  { %v536_v35 = vpop.permute.xlu1 %535  ;;  %v682_v36 = vpop.permute.xlu2 %681 }
 0x2f7   :  { %v552_v37 = vperm.slane %v536_v35, %v1200_v15  ;;  %v698_v38 = vperm.slane %v682_v36, %v1200_v15  ;;  %v685_v46 = vpop.permute.xlu0 %684 }
 0x2f8   :  { %v699_v55 = vperm.slane %v685_v46, %v1200_v15 }
 0x2f9   :  { %v559_v42 = vsel %vm282_vm2, %v552_v37, %v558_v40  ;;  %v705_v43 = vsel %vm282_vm2, %v698_v38, %v704_v41 }
 0x2fa   :  { %v565_v44 = vsel %vm289_vm3, %v559_v42, 0.0  ;;  %v711_v45 = vsel %vm289_vm3, %v705_v43, 0.0  ;;  %v706_v61 = vsel %vm278_vm0, %v700_v59, %v699_v55 }
 0x2fb   :  { %566 = vadd.xlane.f32.xlu0 %v565_v44  ;;  %712 = vadd.xlane.f32.xlu1 %v711_v45  ;;  %v707_v4 = vsel %vm280_vm1, %v701_v62, %v706_v61 }
 0x2fe   :  { %v542_v47 = vpop.permute.xlu1 %541 }
 0x2ff   :  { %v554_v48 = vperm.slane %v542_v47, %v1200_v15  ;;  %v548_v49 = vpop.permute.xlu0 %547 }
 0x300   :  { %v556_v54 = vperm.slane %v548_v49, %v1200_v15 }
 0x301   :  { %v560_v53 = vsel %vm278_vm0, %v554_v48, %v553_v50 }
 0x306   :  { %v545_v51 = vpop.permute.xlu1 %544 }
 0x307   :  { %v555_v52 = vperm.slane %v545_v51, %v1200_v15 }
 0x309   :  { %v561_v56 = vsel %vm280_vm1, %v555_v52, %v560_v53 }
 0x30a   :  { %v562_v58 = vsel %vm282_vm2, %v556_v54, %v561_v56 }
 0x30b   :  { %v568_v60 = vsel %vm289_vm3, %v562_v58, 0.0 }
 0x30c   :  { %569 = vadd.xlane.f32.xlu2 %v568_v60 }
 0x30e   :  { %v694_v39 = vpop.permute.xlu1 %693 }
 0x30f   :  { %v702_v63 = vperm.slane %v694_v39, %v1200_v15 }
 0x311   :  { %v708_v8 = vsel %vm282_vm2, %v702_v63, %v707_v4 }
 0x312   :  { %v714_v9 = vsel %vm289_vm3, %v708_v8, 0.0 }
 0x313   :  { %715 = vadd.xlane.f32.xlu0 %v714_v9 }
 0x314   :  { %724 = vperm.xlu1 %888, %v892_v5  }
 0x31c   :  { %890 = vset.pattern.permute.xlu1 %v1094_v19 }
 0x324   :  { %578 = vperm.xlu2 %887, %v893_v10  }
 0x32c   :  { %889 = vset.pattern.permute.xlu2 %v1094_v19 }
 0x36e   :  { %v713_v15 = vpop.xlane.xlu1 %712  ;;  %v567_v11 = vpop.xlane.xlu0 %566 }
 0x37f   :  { %v570_v12 = vpop.xlane.xlu2 %569 }
 0x386   :  { %v725_v57 = vpop.permute.xlu1 %724  ;;  %v716_v13 = vpop.xlane.xlu0 %715 }
 0x387   :  { %v727_v14 = vadd.f32 %v725_v57, %v713_v15  ;;  %v728_v16 = vadd.f32 %v725_v57, %v716_v13  ;;  %v579_v17 = vpop.permute.xlu2 %578  ;;  %v787_v57 = vrot.slane %v1174_v3, 4  ;;  %v816_v13 = vrot.slane %v1180_v7, 4 }
 0x388   :  { %v581_v18 = vadd.f32 %v579_v17, %v567_v11  ;;  %v582_v20 = vadd.f32 %v579_v17, %v570_v12 }
 0x389   :  { %v859_v21 = vmul.f32 -1.442695, %v727_v14  ;;  %v860_v22 = vmul.f32 -1.442695, %v728_v16 }
 0x38a   :  { %v857_v24 = vmul.f32 -1.442695, %v581_v18  ;;  %v858_v25 = vmul.f32 -1.442695, %v582_v20 }
 0x38b   :  { %894 = vpow2.f32 %v859_v21 }
 0x38c   :  { %896 = vpow2.f32 %v860_v22 }
 0x38d   :  { %898 = vpow2.f32 %v857_v24 }
 0x38e   :  { %900 = vpow2.f32 %v858_v25 }
 0x391   :  { %v895_v0 = vpop.eup %894 }
 0x392   :  { %v897_v19 = vpop.eup %896  ;;  %v1295_v26 = vadd.f32 1.0, %v895_v0 }
 0x393   :  { %v899_v27 = vpop.eup %898  ;;  %v736_v28 = vadd.f32 1.0, %v897_v19 }
 0x394   :  { %v901_v29 = vpop.eup %900  ;;  %902 = vrcp.f32 %v1295_v26  ;;  %v589_v30 = vadd.f32 1.0, %v899_v27  ;;  %v748_v9 = vand.u32 2147483648, %v1295_v26  ;;  %vm742_vm1 = vweird.f32 %v1295_v26 }
 0x395   :  { %904 = vrcp.f32 %v736_v28  ;;  %v590_v31 = vadd.f32 1.0, %v901_v29  ;;  %vm757_vm4 = vweird.f32 %v736_v28  ;;  %v761_v40 = vand.u32 2147483647, %v736_v28 }
 0x396   :  { %906 = vrcp.f32 %v589_v30  ;;  %v763_v42 = vand.u32 2147483648, %v736_v28  ;;  %vm596_vm5 = vweird.f32 %v589_v30  ;;  %v602_v47 = vand.u32 2147483648, %v589_v30 }
 0x397   :  { %908 = vrcp.f32 %v590_v31  ;;  %v617_v48 = vand.u32 2147483648, %v590_v31  ;;  %v600_v50 = vand.u32 2147483647, %v589_v30  ;;  %v615_v53 = vand.u32 2147483647, %v590_v31 }
 0x398   :  { %vm762_vm10 = vcmp.eq.f32.partialorder %v761_v40, 8.507059e+37  ;;  %v764_v54 = vor.u32 1.1754944e-38, %v763_v42  ;;  %vm611_vm11 = vweird.f32 %v590_v31  ;;  %v603_v60 = vor.u32 1.1754944e-38, %v602_v47 }
 0x399   :  { %v618_v62 = vor.u32 1.1754944e-38, %v617_v48  ;;  %vm601_vm14 = vcmp.eq.f32.partialorder %v600_v50, 8.507059e+37  ;;  %vm616_vm15 = vcmp.eq.f32.partialorder %v615_v53, 8.507059e+37  ;;  %v746_v10 = vand.u32 2147483647, %v1295_v26 }
 0x39a   :  { %v903_v32 = vpop.eup %902  ;;  %v749_v11 = vor.u32 1.1754944e-38, %v748_v9 }
 0x39b   :  { %v905_v1 = vpop.eup %904  ;;  %v738_v33 = vmul.f32 %v903_v32, %v1295_v26  ;;  %vm743_vm0 = vweird.f32 %v903_v32  ;;  %vm747_vm3 = vcmp.eq.f32.partialorder %v746_v10, 8.507059e+37 }
 0x39c   :  { %v907_v34 = vpop.eup %906  ;;  %v753_v35 = vmul.f32 %v905_v1, %v736_v28  ;;  %vm758_vm6 = vweird.f32 %v905_v1  ;;  %vm744_vm2 = vmor %vm742_vm1, %vm743_vm0 }
 0x39d   :  { %v909_v36 = vpop.eup %908  ;;  %v592_v37 = vmul.f32 %v907_v34, %v589_v30  ;;  %v739_v44 = vsub.f32 1.0, %v738_v33  ;;  %vm597_vm7 = vweird.f32 %v907_v34  ;;  %vm759_vm9 = vmor %vm757_vm4, %vm758_vm6  ;;  %vm788_vm4 = vcmask 1043456  }
 0x39e   :  { %v754_v38 = vsub.f32 1.0, %v753_v35  ;;  %v607_v41 = vmul.f32 %v909_v36, %v590_v31  ;;  %vm612_vm8 = vweird.f32 %v909_v36  ;;  %vm598_vm12 = vmor %vm596_vm5, %vm597_vm7  ;;  %v790_v14 = vsel %vm788_vm4, %v787_v57, %v1172_v2 }
 0x39f   :  { %v593_v43 = vsub.f32 1.0, %v592_v37  ;;  %v740_v56 = vmul.f32 %v903_v32, %v739_v44  ;;  %vm613_vm13 = vmor %vm611_vm11, %vm612_vm8  ;;  %v818_v17 = vsel %vm788_vm4, %v816_v13, %v1178_v6  ;;  %v791_v18 = vrot.slane %v790_v14, 4 }
 0x3a0   :  { %v755_v45 = vmul.f32 %v905_v1, %v754_v38  ;;  %v608_v46 = vsub.f32 1.0, %v607_v41  ;;  %v819_v21 = vrot.slane %v818_v17, 4  ;;  %v789_v26 = vsel %vm788_vm4, %v1172_v2, %v787_v57 }
 0x3a1   :  { %v594_v49 = vmul.f32 %v907_v34, %v593_v43  ;;  %v741_v8 = vadd.f32 %v903_v32, %v740_v56  ;;  %v817_v27 = vsel %vm788_vm4, %v1178_v6, %v816_v13 }
 0x3a2   :  { %v756_v51 = vadd.f32 %v905_v1, %v755_v45  ;;  %v609_v52 = vmul.f32 %v909_v36, %v608_v46 }
 0x3a3   :  { %v595_v55 = vadd.f32 %v907_v34, %v594_v49  ;;  %v745_v15 = vsel %vm744_vm2, %v903_v32, %v741_v8 }
 0x3a4   :  { %v760_v58 = vsel %vm759_vm9, %v905_v1, %v756_v51  ;;  %v610_v59 = vadd.f32 %v909_v36, %v609_v52  ;;  %v750_v12 = vsel %vm747_vm3, %v749_v11, %v745_v15 }
 0x3a5   :  { %v765_v61 = vsel %vm762_vm10, %v764_v54, %v760_v58  ;;  %v599_v39 = vsel %vm598_vm12, %v907_v34, %v595_v55 }
 0x3a6   :  { %807 = vperm.xlu1 %890, %v765_v61   ;;  %v614_v63 = vsel %vm613_vm13, %v909_v36, %v610_v59  ;;  %v604_v4 = vsel %vm601_vm14, %v603_v60, %v599_v39 }
 0x3a7   :  { %v619_v5 = vsel %vm616_vm15, %v618_v62, %v614_v63  ;;  %769 = vperm.xlu0 %886, %v604_v4  }
 0x3a8   :  { %778 = vperm.xlu2 %889, %v619_v5  }
 0x3af   :  { %798 = vperm.xlu0 %886, %v750_v12  }
 0x402   :  { %v779_v16 = vpop.permute.xlu2 %778 }
 0x403   :  { %v784_v20 = vperm.slane %v779_v16, %v1186_v23 }
 0x405   :  { %v795_v0 = vmul.f32 %v791_v18, %v784_v20 }
 0x418   :  { %v808_v22 = vpop.permute.xlu1 %807 }
 0x419   :  { %v813_v24 = vperm.slane %v808_v22, %v1186_v23  ;;  %v770_v25 = vpop.permute.xlu0 %769 }
 0x41a   :  { %v775_v7 = vperm.slane %v770_v25, %v1186_v23 }
 0x41b   :  { %v823_v3 = vmul.f32 %v819_v21, %v813_v24 }
 0x41c   :  { %v794_v30 = vmul.f32 %v789_v26, %v775_v7 }
 0x41d   :  { %v825_v19 = vadd.f32 %v823_v3, %v795_v0 }
 0x41f   :  { %830 = vst [vmem:[#allocation1 + $0x1] ss:$2 sm:$0xff] %v825_v19 }
 0x421   :  { %v799_v28 = vpop.permute.xlu0 %798 }
 0x422   :  { %v804_v29 = vperm.slane %v799_v28, %v1186_v23 }
 0x424   :  { %v822_v31 = vmul.f32 %v817_v27, %v804_v29 }
 0x426   :  { %v824_v32 = vadd.f32 %v822_v31, %v794_v30 }
 0x428   :  { %828 = vst [vmem:[#allocation1] ss:$2 sm:$0xff] %v824_v32 }
 0x42f   :  { %v831_v1 = vld.sshfl [vmem:[#allocation1] sm:$0xff pattern:$0x75316420]  ;;  %v832_v33 = vld.sshfl [vmem:[#allocation1 + $0x8] sm:$0xff pattern:$0x75316420] }
 0x430   :  { %835 = vst [vmem:[#allocation13] sm:$0xff] %v831_v1 }
 0x431   :  { %836 = vst [vmem:[#allocation13 + $0x8] sm:$0xff] %v832_v33 }
 0x432   :  { %847 = dma.vmem_to_hbm [thread:$0]  %s843_s8, 256, %s845_s19, [#allocation4]  }
 0x433   :  { %1086 = dma.done.wait [#allocation4], 256  }
 0x434   :  { %1087 = vsyncadd [#allocation4], 4294967040 }
 0x435   :  { %852 = vsyncpa [#allocation3], 1 }
 0x436   :  { %853 = vsyncpa [#allocation6], 1 }
 0x437   :  { %854 = vsyncpa [#allocation9], 1 }
 0x438   :  { %855 = vsyncpa [#allocation12], 1 }
 0x439   :  { %856 = vsyncpa [#allocation4], 1 }

</bundles_post_ra>
